<compile_context>
chip_gen: v7x
topology: tpu7x:2x2x1
jax: 0.10.0
libtpu: 0.0.40
codegen_flags: <defaults>
</compile_context>

<pallas_src>
import jax
import jax.numpy as jnp
from jax.experimental import pallas as pl
from jax.experimental.pallas import tpu as pltpu


def synthesizer_kernel(img_ref, scale_ref, bias_ref, snd_ref, out_ref):
    # img_ref:   (TB, C)      VMEM  image features for this batch block
    # scale_ref: (1, C)       VMEM  learnable per-channel scale
    # bias_ref:  (1, 1)       SMEM  scalar bias (scalar-path read)
    # snd_ref:   (TB, C*S)    VMEM  flattened sound features (channel-major slabs)
    # out_ref:   (TB, S)      VMEM  output rows (sublane + lane dense)
    C = img_ref.shape[1]
    S = out_ref.shape[1]

    w = img_ref[...] * scale_ref[...]                       # (TB, C)   VPU
    # z[b, s] = sum_c w[b, c] * snd[b, c*S + s]:
    # per-channel (TB, 1) lane-broadcast multiply-accumulate over (TB, S)
    # lane slabs.  Pure VPU work; no MXU, no cross-layout reshapes.
    z = w[:, 0:1] * snd_ref[:, 0:S]
    for c in range(1, C):                                   # C is small & static
        z = z + w[:, c:c + 1] * snd_ref[:, c * S:(c + 1) * S]
    out_ref[...] = (z + bias_ref[0, 0]).astype(out_ref.dtype)


def _round_up(x, m):
    return ((x + m - 1) // m) * m


def _vmem_capacity_bytes():
    try:
        cap = getattr(pltpu.get_tpu_info(), "vmem_capacity_bytes", None)
        if cap:
            return int(cap)
    except Exception:
        pass
    return 64 * 1024 * 1024  # v7x has the smallest VMEM; conservative fallback


def synthesizer_forward(image_features, sound_features, scale, bias):
    """image_features: (B, C) f32, sound_features: (B, C, HS, WS) f32,
    scale: (C,) f32, bias: (1,) f32  ->  (B, 1, HS, WS) f32"""
    B, C, HS, WS = sound_features.shape
    S = HS * WS

    snd_flat = sound_features.reshape(B, C * S)   # free contiguous view
    scale2 = scale.reshape(1, C)
    bias2 = bias.reshape(1, 1)

    # Generation-aware batch block TB (multiple of 8 for sublane-dense stores).
    vmem_cap = _vmem_capacity_bytes()
    # Per-batch-row VMEM bytes incl. lane padding: sound + image + output
    # block + one (TB, S)-sized compiler temp for the accumulator.
    bytes_per_row = (_round_up(C * S, 128) + _round_up(C, 128)
                     + 2 * _round_up(S, 128)) * 4
    budget = (vmem_cap * 3) // 8                  # for the double-buffered blocks
    tb_fit = max(8, (budget // (2 * bytes_per_row)) // 8 * 8)

    b_round8 = _round_up(B, 8)
    tb = min(tb_fit, b_round8)
    if b_round8 >= 16:
        # Keep at least two "parallel" grid blocks so both v7x TensorCores
        # stream (negligible extra step overhead on single-TC v5e/v6e).
        tb = min(tb, _round_up((B + 1) // 2, 8))
    tb = max(tb, 8)
    grid = (B + tb - 1) // tb                     # ragged tail -> masked block

    out = pl.pallas_call(
        synthesizer_kernel,
        out_shape=jax.ShapeDtypeStruct((B, S), jnp.float32),
        grid_spec=pltpu.PrefetchScalarGridSpec(
            num_scalar_prefetch=0,
            grid=(grid,),
            in_specs=[
                pl.BlockSpec((tb, C), lambda i: (i, 0)),
                pl.BlockSpec((1, C), lambda i: (0, 0)),
                pl.BlockSpec(memory_space=pltpu.MemorySpace.SMEM),
                pl.BlockSpec((tb, C * S), lambda i: (i, 0)),
            ],
            out_specs=pl.BlockSpec((tb, S), lambda i: (i, 0)),
        ),
        compiler_params=pltpu.CompilerParams(
            dimension_semantics=("parallel",),
            vmem_limit_bytes=(vmem_cap * 3) // 4,
        ),
    )(image_features, scale2, bias2, snd_flat)

    return out.reshape(B, 1, HS, WS)


def synthesizer_reference(image_features, sound_features, scale, bias):
    B, C, HS, WS = sound_features.shape
    img = image_features.reshape(B, 1, C)
    tmp = sound_features.reshape(B, C, HS * WS)
    tmp2 = img * scale.reshape(1, 1, C)
    z = jnp.einsum("bic,bcs->bis", tmp2, tmp)
    z = z.reshape(B, 1, HS, WS) + bias.reshape(1, 1, 1, 1)
    return z


if __name__ == "__main__":
    fc_dim = 16           # C == fc_dim so that scale broadcast matches module
    B, C, HS, WS = 2, fc_dim, 16, 16

    key = jax.random.PRNGKey(0)
    k_img, k_snd = jax.random.split(key)
    image_features = jax.random.normal(k_img, (B, C), dtype=jnp.float32)
    sound_features = jax.random.normal(k_snd, (B, C, HS, WS), dtype=jnp.float32)

    # Deterministic parameter init, matching nn.Parameter(torch.ones/zeros).
    scale = jnp.ones((fc_dim,), dtype=jnp.float32)
    bias = jnp.zeros((1,), dtype=jnp.float32)

    z = synthesizer_forward(image_features, sound_features, scale, bias)
    z = jax.block_until_ready(z)

    z_ref = synthesizer_reference(image_features, sound_features, scale, bias)
    assert z.shape == (B, 1, HS, WS), z.shape
    assert jnp.allclose(z, z_ref, atol=1e-5, rtol=1e-5), \
        float(jnp.max(jnp.abs(z - z_ref)))

    print("KERNEL_OK")
</pallas_src>

<mosaic_0001>
module attributes {stable_mosaic.version = 11 : i64} {
  func.func @synthesizer_kernel(%arg0: i32, %arg1: memref<8x16xf32, #tpu.memory_space<vmem>>, %arg2: memref<1x16xf32, #tpu.memory_space<vmem>>, %arg3: memref<1x1xf32, #tpu.memory_space<smem>>, %arg4: memref<8x4096xf32, #tpu.memory_space<vmem>>, %arg5: memref<8x256xf32, #tpu.memory_space<vmem>>) attributes {dimension_semantics = [#tpu.dimension_semantics<parallel>], iteration_bounds = array<i64: 1>, scalar_prefetch = 0 : i64, scratch_operands = 0 : i64, tpu.core_type = #tpu.core_type<tc>, window_params = [{transform_indices = @transform_0, window_bounds = array<i64: 8, 16>}, {pipeline_mode = #tpu.pipeline_mode<synchronous>, transform_indices = @transform_1, window_bounds = array<i64: 1, 16>}, {transform_indices = @transform_2, window_bounds = array<i64: 1, 1>}, {transform_indices = @transform_3, window_bounds = array<i64: 8, 4096>}, {transform_indices = @transform_4, window_bounds = array<i64: 8, 256>}]} {
    %c0 = arith.constant 0 : index
    %c0_0 = arith.constant 0 : index
    %0 = vector.load %arg1[%c0, %c0_0] : memref<8x16xf32, #tpu.memory_space<vmem>>, vector<8x16xf32>
    %c0_1 = arith.constant 0 : index
    %c0_2 = arith.constant 0 : index
    %1 = vector.load %arg2[%c0_1, %c0_2] : memref<1x16xf32, #tpu.memory_space<vmem>>, vector<1x16xf32>
    %2 = vector.broadcast %1 : vector<1x16xf32> to vector<8x16xf32>
    %3 = arith.mulf %0, %2 : vector<8x16xf32>
    %4 = vector.extract_strided_slice %3 {offsets = [0, 0], sizes = [8, 1], strides = [1, 1]} : vector<8x16xf32> to vector<8x1xf32>
    %c0_3 = arith.constant 0 : index
    %c0_4 = arith.constant 0 : index
    %5 = vector.load %arg4[%c0_3, %c0_4] : memref<8x4096xf32, #tpu.memory_space<vmem>>, vector<8x256xf32>
    %6 = vector.broadcast %4 : vector<8x1xf32> to vector<8x256xf32>
    %7 = arith.mulf %6, %5 : vector<8x256xf32>
    %8 = vector.extract_strided_slice %3 {offsets = [0, 1], sizes = [8, 1], strides = [1, 1]} : vector<8x16xf32> to vector<8x1xf32>
    %c0_5 = arith.constant 0 : index
    %c256 = arith.constant 256 : index
    %9 = vector.load %arg4[%c0_5, %c256] : memref<8x4096xf32, #tpu.memory_space<vmem>>, vector<8x256xf32>
    %10 = vector.broadcast %8 : vector<8x1xf32> to vector<8x256xf32>
    %11 = arith.mulf %10, %9 : vector<8x256xf32>
    %12 = arith.addf %7, %11 : vector<8x256xf32>
    %13 = vector.extract_strided_slice %3 {offsets = [0, 2], sizes = [8, 1], strides = [1, 1]} : vector<8x16xf32> to vector<8x1xf32>
    %c0_6 = arith.constant 0 : index
    %c512 = arith.constant 512 : index
    %14 = vector.load %arg4[%c0_6, %c512] : memref<8x4096xf32, #tpu.memory_space<vmem>>, vector<8x256xf32>
    %15 = vector.broadcast %13 : vector<8x1xf32> to vector<8x256xf32>
    %16 = arith.mulf %15, %14 : vector<8x256xf32>
    %17 = arith.addf %12, %16 : vector<8x256xf32>
    %18 = vector.extract_strided_slice %3 {offsets = [0, 3], sizes = [8, 1], strides = [1, 1]} : vector<8x16xf32> to vector<8x1xf32>
    %c0_7 = arith.constant 0 : index
    %c768 = arith.constant 768 : index
    %19 = vector.load %arg4[%c0_7, %c768] : memref<8x4096xf32, #tpu.memory_space<vmem>>, vector<8x256xf32>
    %20 = vector.broadcast %18 : vector<8x1xf32> to vector<8x256xf32>
    %21 = arith.mulf %20, %19 : vector<8x256xf32>
    %22 = arith.addf %17, %21 : vector<8x256xf32>
    %23 = vector.extract_strided_slice %3 {offsets = [0, 4], sizes = [8, 1], strides = [1, 1]} : vector<8x16xf32> to vector<8x1xf32>
    %c0_8 = arith.constant 0 : index
    %c1024 = arith.constant 1024 : index
    %24 = vector.load %arg4[%c0_8, %c1024] : memref<8x4096xf32, #tpu.memory_space<vmem>>, vector<8x256xf32>
    %25 = vector.broadcast %23 : vector<8x1xf32> to vector<8x256xf32>
    %26 = arith.mulf %25, %24 : vector<8x256xf32>
    %27 = arith.addf %22, %26 : vector<8x256xf32>
    %28 = vector.extract_strided_slice %3 {offsets = [0, 5], sizes = [8, 1], strides = [1, 1]} : vector<8x16xf32> to vector<8x1xf32>
    %c0_9 = arith.constant 0 : index
    %c1280 = arith.constant 1280 : index
    %29 = vector.load %arg4[%c0_9, %c1280] : memref<8x4096xf32, #tpu.memory_space<vmem>>, vector<8x256xf32>
    %30 = vector.broadcast %28 : vector<8x1xf32> to vector<8x256xf32>
    %31 = arith.mulf %30, %29 : vector<8x256xf32>
    %32 = arith.addf %27, %31 : vector<8x256xf32>
    %33 = vector.extract_strided_slice %3 {offsets = [0, 6], sizes = [8, 1], strides = [1, 1]} : vector<8x16xf32> to vector<8x1xf32>
    %c0_10 = arith.constant 0 : index
    %c1536 = arith.constant 1536 : index
    %34 = vector.load %arg4[%c0_10, %c1536] : memref<8x4096xf32, #tpu.memory_space<vmem>>, vector<8x256xf32>
    %35 = vector.broadcast %33 : vector<8x1xf32> to vector<8x256xf32>
    %36 = arith.mulf %35, %34 : vector<8x256xf32>
    %37 = arith.addf %32, %36 : vector<8x256xf32>
    %38 = vector.extract_strided_slice %3 {offsets = [0, 7], sizes = [8, 1], strides = [1, 1]} : vector<8x16xf32> to vector<8x1xf32>
    %c0_11 = arith.constant 0 : index
    %c1792 = arith.constant 1792 : index
    %39 = vector.load %arg4[%c0_11, %c1792] : memref<8x4096xf32, #tpu.memory_space<vmem>>, vector<8x256xf32>
    %40 = vector.broadcast %38 : vector<8x1xf32> to vector<8x256xf32>
    %41 = arith.mulf %40, %39 : vector<8x256xf32>
    %42 = arith.addf %37, %41 : vector<8x256xf32>
    %43 = vector.extract_strided_slice %3 {offsets = [0, 8], sizes = [8, 1], strides = [1, 1]} : vector<8x16xf32> to vector<8x1xf32>
    %c0_12 = arith.constant 0 : index
    %c2048 = arith.constant 2048 : index
    %44 = vector.load %arg4[%c0_12, %c2048] : memref<8x4096xf32, #tpu.memory_space<vmem>>, vector<8x256xf32>
    %45 = vector.broadcast %43 : vector<8x1xf32> to vector<8x256xf32>
    %46 = arith.mulf %45, %44 : vector<8x256xf32>
    %47 = arith.addf %42, %46 : vector<8x256xf32>
    %48 = vector.extract_strided_slice %3 {offsets = [0, 9], sizes = [8, 1], strides = [1, 1]} : vector<8x16xf32> to vector<8x1xf32>
    %c0_13 = arith.constant 0 : index
    %c2304 = arith.constant 2304 : index
    %49 = vector.load %arg4[%c0_13, %c2304] : memref<8x4096xf32, #tpu.memory_space<vmem>>, vector<8x256xf32>
    %50 = vector.broadcast %48 : vector<8x1xf32> to vector<8x256xf32>
    %51 = arith.mulf %50, %49 : vector<8x256xf32>
    %52 = arith.addf %47, %51 : vector<8x256xf32>
    %53 = vector.extract_strided_slice %3 {offsets = [0, 10], sizes = [8, 1], strides = [1, 1]} : vector<8x16xf32> to vector<8x1xf32>
    %c0_14 = arith.constant 0 : index
    %c2560 = arith.constant 2560 : index
    %54 = vector.load %arg4[%c0_14, %c2560] : memref<8x4096xf32, #tpu.memory_space<vmem>>, vector<8x256xf32>
    %55 = vector.broadcast %53 : vector<8x1xf32> to vector<8x256xf32>
    %56 = arith.mulf %55, %54 : vector<8x256xf32>
    %57 = arith.addf %52, %56 : vector<8x256xf32>
    %58 = vector.extract_strided_slice %3 {offsets = [0, 11], sizes = [8, 1], strides = [1, 1]} : vector<8x16xf32> to vector<8x1xf32>
    %c0_15 = arith.constant 0 : index
    %c2816 = arith.constant 2816 : index
    %59 = vector.load %arg4[%c0_15, %c2816] : memref<8x4096xf32, #tpu.memory_space<vmem>>, vector<8x256xf32>
    %60 = vector.broadcast %58 : vector<8x1xf32> to vector<8x256xf32>
    %61 = arith.mulf %60, %59 : vector<8x256xf32>
    %62 = arith.addf %57, %61 : vector<8x256xf32>
    %63 = vector.extract_strided_slice %3 {offsets = [0, 12], sizes = [8, 1], strides = [1, 1]} : vector<8x16xf32> to vector<8x1xf32>
    %c0_16 = arith.constant 0 : index
    %c3072 = arith.constant 3072 : index
    %64 = vector.load %arg4[%c0_16, %c3072] : memref<8x4096xf32, #tpu.memory_space<vmem>>, vector<8x256xf32>
    %65 = vector.broadcast %63 : vector<8x1xf32> to vector<8x256xf32>
    %66 = arith.mulf %65, %64 : vector<8x256xf32>
    %67 = arith.addf %62, %66 : vector<8x256xf32>
    %68 = vector.extract_strided_slice %3 {offsets = [0, 13], sizes = [8, 1], strides = [1, 1]} : vector<8x16xf32> to vector<8x1xf32>
    %c0_17 = arith.constant 0 : index
    %c3328 = arith.constant 3328 : index
    %69 = vector.load %arg4[%c0_17, %c3328] : memref<8x4096xf32, #tpu.memory_space<vmem>>, vector<8x256xf32>
    %70 = vector.broadcast %68 : vector<8x1xf32> to vector<8x256xf32>
    %71 = arith.mulf %70, %69 : vector<8x256xf32>
    %72 = arith.addf %67, %71 : vector<8x256xf32>
    %73 = vector.extract_strided_slice %3 {offsets = [0, 14], sizes = [8, 1], strides = [1, 1]} : vector<8x16xf32> to vector<8x1xf32>
    %c0_18 = arith.constant 0 : index
    %c3584 = arith.constant 3584 : index
    %74 = vector.load %arg4[%c0_18, %c3584] : memref<8x4096xf32, #tpu.memory_space<vmem>>, vector<8x256xf32>
    %75 = vector.broadcast %73 : vector<8x1xf32> to vector<8x256xf32>
    %76 = arith.mulf %75, %74 : vector<8x256xf32>
    %77 = arith.addf %72, %76 : vector<8x256xf32>
    %78 = vector.extract_strided_slice %3 {offsets = [0, 15], sizes = [8, 1], strides = [1, 1]} : vector<8x16xf32> to vector<8x1xf32>
    %c0_19 = arith.constant 0 : index
    %c3840 = arith.constant 3840 : index
    %79 = vector.load %arg4[%c0_19, %c3840] : memref<8x4096xf32, #tpu.memory_space<vmem>>, vector<8x256xf32>
    %80 = vector.broadcast %78 : vector<8x1xf32> to vector<8x256xf32>
    %81 = arith.mulf %80, %79 : vector<8x256xf32>
    %82 = arith.addf %77, %81 : vector<8x256xf32>
    %c0_20 = arith.constant 0 : index
    %c0_21 = arith.constant 0 : index
    %83 = memref.load %arg3[%c0_20, %c0_21] : memref<1x1xf32, #tpu.memory_space<smem>>
    %84 = vector.broadcast %83 : f32 to vector<8x256xf32>
    %85 = arith.addf %82, %84 : vector<8x256xf32>
    %c0_22 = arith.constant 0 : index
    %c0_23 = arith.constant 0 : index
    %86 = vector.load %arg5[%c0_22, %c0_23] : memref<8x256xf32, #tpu.memory_space<vmem>>, vector<8x256xf32>
    tpu.vector_store %arg5[%c0_22, %c0_23], %85 {strides = array<i32>} : memref<8x256xf32, #tpu.memory_space<vmem>>, vector<8x256xf32>,
    return
  }
  func.func @transform_0(%arg0: i32) -> (i32, i32) {
    %c0_i32 = arith.constant 0 : i32
    %c0_i32_0 = arith.constant 0 : i32
    return %arg0, %c0_i32 : i32, i32
  }
  func.func @transform_1(%arg0: i32) -> (i32, i32) {
    %c0_i32 = arith.constant 0 : i32
    %c0_i32_0 = arith.constant 0 : i32
    %c0_i32_1 = arith.constant 0 : i32
    return %c0_i32, %c0_i32_0 : i32, i32
  }
  func.func @transform_2(%arg0: i32) -> (i32, i32) {
    %c0_i32 = arith.constant 0 : i32
    %c0_i32_0 = arith.constant 0 : i32
    %c0_i32_1 = arith.constant 0 : i32
    return %c0_i32, %c0_i32_0 : i32, i32
  }
  func.func @transform_3(%arg0: i32) -> (i32, i32) {
    %c0_i32 = arith.constant 0 : i32
    %c0_i32_0 = arith.constant 0 : i32
    return %arg0, %c0_i32 : i32, i32
  }
  func.func @transform_4(%arg0: i32) -> (i32, i32) {
    %c0_i32 = arith.constant 0 : i32
    %c0_i32_0 = arith.constant 0 : i32
    return %arg0, %c0_i32 : i32, i32
  }
}

</mosaic_0001>

<bundles_post_ra>
// kernel: tpu_custom_call.1
= control target key start
LH: loop header
LB: loop body
LE: loop exit
PB: predicated region body
PF: predicated region fallthrough
CT: control target
= control target key end

     0   :  { %10 = vsyncpa [#allocation4], 0  ;;  %s875_s0 = inlined_call_operand.vmem [shape: f32[2,16], index: 0, kind: input, shape index: {}]   ;;  %s876_s1 = inlined_call_operand.vmem [shape: f32[1,16], index: 1, kind: input, shape index: {}]   ;;  %s877_s2 = inlined_call_operand.<no memory space> [shape: f32[1,1], index: 2, kind: input, shape index: {}]   ;;  %s878_s3 = inlined_call_operand.hbm [shape: f32[2,4096], index: 3, kind: input, shape index: {}]   ;;  %s879_s4 = inlined_call_operand.hbm [shape: f32[2,256], index: 4, kind: output, shape index: {}]  }
   0x1   :  { %11 = vsyncpa [#allocation5], 0 }
   0x2   :  { %22 = vsyncadd [#allocation4], 3072  ;;  %s756_s15 = smov [#allocation3]   ;;  %s708_s19 = scalar_lea.hbm %s878_s3, 1024 }
   0x3   :  { %s23_s16 = sshll.u32 %s756_s15, 4  ;;  %p709_p0 = scmp.ne.s32.totalorder %s878_s3, %s708_s19  ;;  %s24_s16 = int_to_ptr.vmem [resolvable:$true] %s23_s16 }
   0x4   :  { %p712_p1 = scmp.lt.u32.totalorder %s708_s19, %s878_s3 }
   0x6   :  { %p714_p2 = pnand %p712_p1, %p709_p0 }
   0x8   :  { %717 = shalt.err (!%p714_p2)
}
   0x9   :  { %s718_s24 = scalar_lea.vmem %s24_s16, 1024  ;;  %s722_s25 = scalar_lea.vmem %s24_s16, 4096 }
   0xa   :  { %p719_p3 = scmp.ne.s32.totalorder %s24_s16, %s718_s24  ;;  %p723_p4 = scmp.lt.s32.totalorder %s24_s16, %s24_s16 }
   0xb   :  { %p724_p5 = scmp.lt.s32.totalorder %s722_s25, %s718_s24 }
   0xd   :  { %p725_p6 = por %p724_p5, %p723_p4 }
   0xf   :  { %p726_p7 = pnand %p725_p6, %p719_p3 }
  0x11   :  { %729 = shalt.err (!%p726_p7)
}
  0x12   :  { %s757_s26 = smov 1024   ;;  %s758_s27 = smov 64  }
  0x13   :  { %29 = dma.hbm_to_vmem [thread:$0]  %s878_s3, 1024, %s24_s16, [#allocation4], %s757_s26, %s757_s26, %s758_s27  }
  0x14   :  { %752 = dma.done.wait [#allocation4], 4096  }
  0x15   :  { %753 = vsyncadd [#allocation4], 4294963200  ;;  %v759_v0 = vmov 2   ;;  %v760_v1 = vmov 0   ;;  %v33_v2 = vld [vmem:[%s875_s0] sm:$0xff]  ;;  %v761_v5 = vmov 3   ;;  %v60_v21 = vlaneseq }
  0x16   :  { %693 = vset.pattern.permute.xlu1 %v759_v0  ;;  %691 = vset.pattern.permute.xlu0 %v760_v1  ;;  %v666_v3 = vld [vmem:[%s876_s1] ss:$0 sm:$0xff]  ;;  %v762_v6 = vmov 1   ;;  %v763_v7 = vmov 4   ;;  %v764_v8 = vmov 5   ;;  %v765_v9 = vmov 6  }
  0x17   :  { %v41_v4 = vmul.f32 %v666_v3, %v33_v2  ;;  %v766_v10 = vmov 8   ;;  %v767_v11 = vmov 7   ;;  %v768_v12 = vmov 11   ;;  %v42_v22 = vld [vmem:[#allocation3] sm:$0xf] }
  0x18   :  { %v769_v13 = vmov 9   ;;  %v770_v14 = vmov 14   ;;  %v771_v15 = vmov 10   ;;  %v772_v16 = vmov 15   ;;  %v43_v23 = vld [vmem:[#allocation3 + $0x40] sm:$0xf] }
  0x19   :  { %118 = vperm.xlu1 %693, %v41_v4   ;;  %48 = vperm.xlu0 %691, %v41_v4   ;;  %v773_v17 = vmov 12   ;;  %v774_v18 = vmov 13   ;;  %v775_v19 = vmov 1983009808   ;;  %v44_v24 = vld [vmem:[#allocation3 + $0x80] sm:$0xf]  ;;  %v55_v36 = vcombine.low %v42_v22, %v43_v23 }
  0x1a   :  { %v58_v20 = vunpack.c.l.s4 %v775_v19  ;;  %v45_v25 = vld [vmem:[#allocation3 + $0xc0] sm:$0xf]  ;;  %v61_v27 = vshrl.u32 %v60_v21, 7  ;;  %v77_v28 = vld [vmem:[#allocation3 + $0x4] sm:$0xf] }
  0x1b   :  { %v113_v29 = vld [vmem:[#allocation3 + $0x8] sm:$0xf]  ;;  %v78_v30 = vld [vmem:[#allocation3 + $0x44] sm:$0xf]  ;;  %v56_v37 = vcombine.low %v44_v24, %v45_v25  ;;  %v149_v38 = vld [vmem:[#allocation3 + $0xc] sm:$0xf] }
  0x1c   :  { %v59_v26 = vunpack.c.0.s8 %v58_v20  ;;  %v79_v31 = vld [vmem:[#allocation3 + $0x84] sm:$0xf]  ;;  %v114_v33 = vld [vmem:[#allocation3 + $0x48] sm:$0xf]  ;;  %v150_v39 = vld [vmem:[#allocation3 + $0x4c] sm:$0xf]  ;;  %v89_v43 = vcombine.low %v77_v28, %v78_v30 }
  0x1d   :  { %694 = vset.pattern.permute.xlu1 %v761_v5  ;;  %692 = vset.pattern.permute.xlu0 %v762_v6  ;;  %v80_v32 = vld [vmem:[#allocation3 + $0xc4] sm:$0xf]  ;;  %v115_v34 = vld [vmem:[#allocation3 + $0x88] sm:$0xf]  ;;  %v151_v40 = vld [vmem:[#allocation3 + $0x8c] sm:$0xf]  ;;  %v125_v50 = vcombine.low %v113_v29, %v114_v33  ;;  %v161_v57 = vcombine.low %v149_v38, %v150_v39 }
  0x1e   :  { %154 = vperm.xlu1 %694, %v41_v4   ;;  %82 = vperm.xlu0 %692, %v41_v4   ;;  %v116_v35 = vld [vmem:[#allocation3 + $0xc8] sm:$0xf]  ;;  %v822_v41 = vsub.s32 %v59_v26, %v61_v27  ;;  %v152_v42 = vld [vmem:[#allocation3 + $0xcc] sm:$0xf]  ;;  %v90_v44 = vcombine.low %v79_v31, %v80_v32  ;;  %v185_v45 = vld [vmem:[#allocation3 + $0x10] sm:$0xf] }
  0x1f   :  { %v186_v46 = vld [vmem:[#allocation3 + $0x50] sm:$0xf]  ;;  %v221_v49 = vld [vmem:[#allocation3 + $0x14] sm:$0xf]  ;;  %v126_v51 = vcombine.low %v115_v34, %v116_v35  ;;  %v162_v58 = vcombine.low %v151_v40, %v152_v42  ;;  %v295_v26 = vld [vmem:[#allocation3 + $0x9c] sm:$0xf] }
  0x20   :  { %v187_v47 = vld [vmem:[#allocation3 + $0x90] sm:$0xf]  ;;  %v63_v52 = vrot.slane %v55_v36, %v822_v41  ;;  %v70_v53 = vrot.slane %v56_v37, %v822_v41  ;;  %v222_v54 = vld [vmem:[#allocation3 + $0x54] sm:$0xf]  ;;  %v97_v59 = vrot.slane %v89_v43, %v822_v41  ;;  %v104_v60 = vrot.slane %v90_v44, %v822_v41  ;;  %v296_v27 = vld [vmem:[#allocation3 + $0xdc] sm:$0xf] }
  0x21   :  { %v188_v48 = vld [vmem:[#allocation3 + $0xd0] sm:$0xf]  ;;  %v223_v55 = vld [vmem:[#allocation3 + $0x94] sm:$0xf]  ;;  %v197_v61 = vcombine.low %v185_v45, %v186_v46  ;;  %v233_v63 = vcombine.low %v221_v49, %v222_v54  ;;  %v133_v1 = vrot.slane %v125_v50, %v822_v41  ;;  %v140_v2 = vrot.slane %v126_v51, %v822_v41  ;;  %v329_v37 = vld [vmem:[#allocation3 + $0x20] sm:$0xf] }
  0x22   :  { %695 = vset.pattern.permute.xlu1 %v763_v7  ;;  %696 = vset.pattern.permute.xlu0 %v764_v8  ;;  %v224_v56 = vld [vmem:[#allocation3 + $0xd4] sm:$0xf]  ;;  %v198_v62 = vcombine.low %v187_v47, %v188_v48  ;;  %v72_v5 = vcombine.high %v63_v52, %v70_v53  ;;  %v257_v7 = vld [vmem:[#allocation3 + $0x18] sm:$0xf]  ;;  %v330_v38 = vld [vmem:[#allocation3 + $0x60] sm:$0xf]  ;;  %v306_v43 = vcombine.low %v295_v26, %v296_v27 }
  0x23   :  { %190 = vperm.xlu1 %695, %v41_v4   ;;  %226 = vperm.xlu0 %696, %v41_v4   ;;  %v234_v0 = vcombine.low %v223_v55, %v224_v56  ;;  %v258_v8 = vld [vmem:[#allocation3 + $0x58] sm:$0xf]  ;;  %v241_v19 = vrot.slane %v233_v63, %v822_v41  ;;  %v141_v22 = vcombine.low %v133_v1, %v140_v2  ;;  %v331_v48 = vld [vmem:[#allocation3 + $0xa0] sm:$0xf]  ;;  %v365_v50 = vld [vmem:[#allocation3 + $0x24] sm:$0xf] }
  0x24   :  { %v269_v21 = vcombine.low %v257_v7, %v258_v8  ;;  %v142_v23 = vcombine.high %v133_v1, %v140_v2  ;;  %v332_v49 = vld [vmem:[#allocation3 + $0xe0] sm:$0xf]  ;;  %v341_v54 = vcombine.low %v329_v37, %v330_v38  ;;  %v366_v55 = vld [vmem:[#allocation3 + $0x64] sm:$0xf]  ;;  %v320_v2 = vrot.slane %v306_v43, %v822_v41  ;;  %v474_v38 = vld [vmem:[#allocation3 + $0x70] sm:$0xf] }
  0x25   :  { %v248_v20 = vrot.slane %v234_v0, %v822_v41  ;;  %v367_v56 = vld [vmem:[#allocation3 + $0xa4] sm:$0xf] }
  0x26   :  { %v277_v42 = vrot.slane %v269_v21, %v822_v41 }
  0x27   :  { %697 = vset.pattern.permute.xlu1 %v765_v9  ;;  %699 = vset.pattern.permute.xlu0 %v766_v10  ;;  %v169_v9 = vrot.slane %v161_v57, %v822_v41  ;;  %v176_v10 = vrot.slane %v162_v58, %v822_v41  ;;  %v249_v40 = vcombine.low %v241_v19, %v248_v20  ;;  %v368_v57 = vld [vmem:[#allocation3 + $0xe4] sm:$0xf] }
  0x28   :  { %262 = vperm.xlu1 %697, %v41_v4   ;;  %334 = vperm.xlu0 %699, %v41_v4   ;;  %v250_v51 = vcombine.high %v241_v19, %v248_v20  ;;  %v378_v7 = vcombine.low %v367_v56, %v368_v57  ;;  %v403_v19 = vld [vmem:[#allocation3 + $0xa8] sm:$0xf] }
  0x29   :  { %v177_v28 = vcombine.low %v169_v9, %v176_v10  ;;  %v178_v33 = vcombine.high %v169_v9, %v176_v10  ;;  %v404_v20 = vld [vmem:[#allocation3 + $0xe8] sm:$0xf] }
  0x2c   :  { %698 = vset.pattern.permute.xlu1 %v767_v11  ;;  %702 = vset.pattern.permute.xlu0 %v768_v12  ;;  %v259_v11 = vld [vmem:[#allocation3 + $0x98] sm:$0xf]  ;;  %v105_v12 = vcombine.low %v97_v59, %v104_v60 }
  0x2d   :  { %298 = vperm.xlu1 %698, %v41_v4   ;;  %442 = vperm.xlu0 %702, %v41_v4  }
  0x31   :  { %700 = vset.pattern.permute.xlu1 %v769_v13  ;;  %705 = vset.pattern.permute.xlu0 %v770_v14  ;;  %v106_v13 = vcombine.high %v97_v59, %v104_v60  ;;  %v205_v14 = vrot.slane %v197_v61, %v822_v41 }
  0x32   :  { %370 = vperm.xlu1 %700, %v41_v4   ;;  %550 = vperm.xlu0 %705, %v41_v4  }
  0x36   :  { %701 = vset.pattern.permute.xlu1 %v771_v15  ;;  %707 = vset.pattern.permute.xlu0 %v772_v16  ;;  %v212_v15 = vrot.slane %v198_v62, %v822_v41 }
  0x37   :  { %406 = vperm.xlu1 %701, %v41_v4  }
  0x38   :  { %v213_v36 = vcombine.low %v205_v14, %v212_v15  ;;  %v214_v39 = vcombine.high %v205_v14, %v212_v15  ;;  %v401_v14 = vld [vmem:[#allocation3 + $0x28] sm:$0xf] }
  0x3b   :  { %703 = vset.pattern.permute.xlu1 %v773_v17  ;;  %v293_v17 = vld [vmem:[#allocation3 + $0x1c] sm:$0xf] }
  0x3c   :  { %478 = vperm.xlu1 %703, %v41_v4  }
  0x40   :  { %704 = vset.pattern.permute.xlu1 %v774_v18  ;;  %v294_v18 = vld [vmem:[#allocation3 + $0x5c] sm:$0xf] }
  0x41   :  { %514 = vperm.xlu1 %704, %v41_v4   ;;  %v305_v32 = vcombine.low %v293_v17, %v294_v18  ;;  %v402_v18 = vld [vmem:[#allocation3 + $0x68] sm:$0xf] }
  0x45   :  { %706 = vset.pattern.permute.xlu1 %v772_v16  ;;  %v260_v16 = vld [vmem:[#allocation3 + $0xd8] sm:$0xf] }
  0x46   :  { %586 = vperm.xlu1 %706, %v41_v4   ;;  %v71_v4 = vcombine.low %v63_v52, %v70_v53  ;;  %v270_v31 = vcombine.low %v259_v11, %v260_v16  ;;  %v313_v53 = vrot.slane %v305_v32, %v822_v41  ;;  %v349_v16 = vrot.slane %v341_v54, %v822_v41  ;;  %v440_v32 = vld [vmem:[#allocation3 + $0xec] sm:$0xf] }
  0x48   :  { %v284_v52 = vrot.slane %v270_v31, %v822_v41  ;;  %v321_v21 = vcombine.low %v313_v53, %v320_v2  ;;  %v439_v31 = vld [vmem:[#allocation3 + $0xac] sm:$0xf] }
  0x4a   :  { %v285_v10 = vcombine.low %v277_v42, %v284_v52  ;;  %v286_v11 = vcombine.high %v277_v42, %v284_v52 }
  0x98   :  { %v119_v3 = vpop.permute.xlu1 %118  ;;  %v49_v6 = vpop.permute.xlu0 %48 }
  0x99   :  { %v75_v24 = vmul.f32 %v71_v4, %v49_v6  ;;  %v76_v25 = vmul.f32 %v72_v5, %v49_v6  ;;  %v145_v44 = vmul.f32 %v141_v22, %v119_v3  ;;  %v146_v45 = vmul.f32 %v142_v23, %v119_v3 }
  0x9a   :  { %v342_v3 = vcombine.low %v331_v48, %v332_v49  ;;  %v377_v6 = vcombine.low %v365_v50, %v366_v55  ;;  %v322_v22 = vcombine.high %v313_v53, %v320_v2 }
  0x9c   :  { %v356_v17 = vrot.slane %v342_v3, %v822_v41  ;;  %v385_v23 = vrot.slane %v377_v6, %v822_v41  ;;  %v548_v6 = vld [vmem:[#allocation3 + $0xf8] sm:$0xf] }
  0x9d   :  { %v155_v29 = vpop.permute.xlu1 %154  ;;  %v83_v30 = vpop.permute.xlu0 %82 }
  0x9e   :  { %v109_v34 = vmul.f32 %v105_v12, %v83_v30  ;;  %v110_v35 = vmul.f32 %v106_v13, %v83_v30  ;;  %v181_v58 = vmul.f32 %v177_v28, %v155_v29  ;;  %v182_v59 = vmul.f32 %v178_v33, %v155_v29  ;;  %v438_v30 = vld [vmem:[#allocation3 + $0x6c] sm:$0xf] }
  0x9f   :  { %v413_v33 = vcombine.low %v401_v14, %v402_v18  ;;  %v358_v37 = vcombine.high %v349_v16, %v356_v17 }
  0xa0   :  { %v111_v46 = vadd.f32 %v109_v34, %v75_v24  ;;  %v112_v47 = vadd.f32 %v110_v35, %v76_v25  ;;  %v392_v24 = vrot.slane %v378_v7, %v822_v41  ;;  %v437_v25 = vld [vmem:[#allocation3 + $0x2c] sm:$0xf]  ;;  %v414_v34 = vcombine.low %v403_v19, %v404_v20  ;;  %v473_v35 = vld [vmem:[#allocation3 + $0x30] sm:$0xf] }
  0xa1   :  { %v421_v52 = vrot.slane %v413_v33, %v822_v41  ;;  %v485_v54 = vcombine.low %v473_v35, %v474_v38 }
  0xa2   :  { %v147_v60 = vadd.f32 %v145_v44, %v111_v46  ;;  %v148_v61 = vadd.f32 %v146_v45, %v112_v47  ;;  %v191_v62 = vpop.permute.xlu1 %190  ;;  %v227_v63 = vpop.permute.xlu0 %226  ;;  %v393_v44 = vcombine.low %v385_v23, %v392_v24  ;;  %v394_v45 = vcombine.high %v385_v23, %v392_v24 }
  0xa3   :  { %v217_v0 = vmul.f32 %v213_v36, %v191_v62  ;;  %v218_v1 = vmul.f32 %v214_v39, %v191_v62  ;;  %v253_v8 = vmul.f32 %v249_v40, %v227_v63  ;;  %v254_v9 = vmul.f32 %v250_v51, %v227_v63  ;;  %v475_v39 = vld [vmem:[#allocation3 + $0xb0] sm:$0xf]  ;;  %v511_v62 = vld [vmem:[#allocation3 + $0xb4] sm:$0xf] }
  0xa4   :  { %v183_v4 = vadd.f32 %v181_v58, %v147_v60  ;;  %v184_v5 = vadd.f32 %v182_v59, %v148_v61  ;;  %v357_v36 = vcombine.low %v349_v16, %v356_v17  ;;  %v476_v40 = vld [vmem:[#allocation3 + $0xf0] sm:$0xf]  ;;  %v449_v46 = vcombine.low %v437_v25, %v438_v30  ;;  %v509_v60 = vld [vmem:[#allocation3 + $0x34] sm:$0xf]  ;;  %v581_v25 = vld [vmem:[#allocation3 + $0x3c] sm:$0xf] }
  0xa5   :  { %v450_v47 = vcombine.low %v439_v31, %v440_v32  ;;  %v428_v53 = vrot.slane %v414_v34, %v822_v41  ;;  %v486_v55 = vcombine.low %v475_v39, %v476_v40  ;;  %v510_v61 = vld [vmem:[#allocation3 + $0x74] sm:$0xf]  ;;  %v582_v30 = vld [vmem:[#allocation3 + $0x7c] sm:$0xf] }
  0xa6   :  { %v219_v12 = vadd.f32 %v217_v0, %v183_v4  ;;  %v220_v13 = vadd.f32 %v218_v1, %v184_v5  ;;  %v512_v63 = vld [vmem:[#allocation3 + $0xf4] sm:$0xf]  ;;  %v545_v0 = vld [vmem:[#allocation3 + $0x38] sm:$0xf]  ;;  %v457_v2 = vrot.slane %v449_v46, %v822_v41  ;;  %v583_v31 = vld [vmem:[#allocation3 + $0xbc] sm:$0xf] }
  0xa7   :  { %v263_v15 = vpop.permute.xlu1 %262  ;;  %v335_v43 = vpop.permute.xlu0 %334  ;;  %v464_v3 = vrot.slane %v450_v47, %v822_v41  ;;  %v546_v4 = vld [vmem:[#allocation3 + $0x78] sm:$0xf]  ;;  %v429_v7 = vcombine.low %v421_v52, %v428_v53  ;;  %v522_v16 = vcombine.low %v511_v62, %v512_v63  ;;  %v584_v32 = vld [vmem:[#allocation3 + $0xfc] sm:$0xf] }
  0xa8   :  { %v255_v26 = vadd.f32 %v253_v8, %v219_v12  ;;  %v256_v27 = vadd.f32 %v254_v9, %v220_v13  ;;  %v289_v28 = vmul.f32 %v285_v10, %v263_v15  ;;  %v290_v29 = vmul.f32 %v286_v11, %v263_v15  ;;  %v547_v5 = vld [vmem:[#allocation3 + $0xb8] sm:$0xf] }
  0xa9   :  { %v361_v58 = vmul.f32 %v357_v36, %v335_v43  ;;  %v362_v59 = vmul.f32 %v358_v37, %v335_v43  ;;  %v430_v8 = vcombine.high %v421_v52, %v428_v53  ;;  %v493_v9 = vrot.slane %v485_v54, %v822_v41 }
  0xaa   :  { %v291_v48 = vadd.f32 %v289_v28, %v255_v26  ;;  %v292_v49 = vadd.f32 %v290_v29, %v256_v27  ;;  %v500_v10 = vrot.slane %v486_v55, %v822_v41  ;;  %v521_v15 = vcombine.low %v509_v60, %v510_v61 }
  0xab   :  { %v557_v17 = vcombine.low %v545_v0, %v546_v4  ;;  %v558_v18 = vcombine.low %v547_v5, %v548_v6  ;;  %v465_v19 = vcombine.low %v457_v2, %v464_v3  ;;  %v466_v20 = vcombine.high %v457_v2, %v464_v3 }
  0xac   :  { %v299_v42 = vpop.permute.xlu1 %298  ;;  %v501_v23 = vcombine.low %v493_v9, %v500_v10  ;;  %v502_v24 = vcombine.high %v493_v9, %v500_v10  ;;  %v529_v33 = vrot.slane %v521_v15, %v822_v41  ;;  %v536_v34 = vrot.slane %v522_v16, %v822_v41 }
  0xad   :  { %v325_v50 = vmul.f32 %v321_v21, %v299_v42  ;;  %v326_v51 = vmul.f32 %v322_v22, %v299_v42  ;;  %v443_v22 = vpop.permute.xlu0 %442  ;;  %v565_v35 = vrot.slane %v557_v17, %v822_v41  ;;  %v572_v36 = vrot.slane %v558_v18, %v822_v41 }
  0xae   :  { %v469_v39 = vmul.f32 %v465_v19, %v443_v22  ;;  %v470_v40 = vmul.f32 %v466_v20, %v443_v22  ;;  %v593_v42 = vcombine.low %v581_v25, %v582_v30  ;;  %v594_v43 = vcombine.low %v583_v31, %v584_v32 }
  0xaf   :  { %v327_v56 = vadd.f32 %v325_v50, %v291_v48  ;;  %v328_v57 = vadd.f32 %v326_v51, %v292_v49  ;;  %v538_v46 = vcombine.high %v529_v33, %v536_v34  ;;  %v573_v47 = vcombine.low %v565_v35, %v572_v36 }
  0xb0   :  { %v574_v48 = vcombine.high %v565_v35, %v572_v36  ;;  %v601_v54 = vrot.slane %v593_v42, %v822_v41  ;;  %v608_v55 = vrot.slane %v594_v43, %v822_v41 }
  0xb1   :  { %v371_v1 = vpop.permute.xlu1 %370  ;;  %v363_v11 = vadd.f32 %v361_v58, %v327_v56  ;;  %v364_v12 = vadd.f32 %v362_v59, %v328_v57  ;;  %v551_v53 = vpop.permute.xlu0 %550 }
  0xb2   :  { %v397_v13 = vmul.f32 %v393_v44, %v371_v1  ;;  %v398_v14 = vmul.f32 %v394_v45, %v371_v1  ;;  %v537_v45 = vcombine.low %v529_v33, %v536_v34  ;;  %v577_v57 = vmul.f32 %v573_v47, %v551_v53 }
  0xb3   :  { %v578_v58 = vmul.f32 %v574_v48, %v551_v53  ;;  %v609_v63 = vcombine.low %v601_v54, %v608_v55  ;;  %v610_v0 = vcombine.high %v601_v54, %v608_v55 }
  0xb4   :  { %v399_v26 = vadd.f32 %v397_v13, %v363_v11  ;;  %v400_v27 = vadd.f32 %v398_v14, %v364_v12 }
  0xb6   :  { %v407_v21 = vpop.permute.xlu1 %406 }
  0xb7   :  { %v433_v28 = vmul.f32 %v429_v7, %v407_v21  ;;  %v434_v29 = vmul.f32 %v430_v8, %v407_v21  ;;  %v618_v8 = vstv %s877_s2 }
  0xb9   :  { %v435_v37 = vadd.f32 %v433_v28, %v399_v26  ;;  %v436_v38 = vadd.f32 %v434_v29, %v400_v27 }
  0xbb   :  { %v479_v44 = vpop.permute.xlu1 %478  ;;  %v471_v49 = vadd.f32 %v469_v39, %v435_v37  ;;  %v472_v50 = vadd.f32 %v470_v40, %v436_v38 }
  0xbc   :  { %v505_v51 = vmul.f32 %v501_v23, %v479_v44  ;;  %v506_v52 = vmul.f32 %v502_v24, %v479_v44 }
  0xbe   :  { %v507_v59 = vadd.f32 %v505_v51, %v471_v49  ;;  %v508_v60 = vadd.f32 %v506_v52, %v472_v50 }
  0xc0   :  { %v515_v56 = vpop.permute.xlu1 %514 }
  0xc1   :  { %v541_v61 = vmul.f32 %v537_v45, %v515_v56  ;;  %v542_v62 = vmul.f32 %v538_v46, %v515_v56 }
  0xc3   :  { %v543_v1 = vadd.f32 %v541_v61, %v507_v59  ;;  %v544_v2 = vadd.f32 %v542_v62, %v508_v60 }
  0xc5   :  { %v579_v3 = vadd.f32 %v577_v57, %v543_v1  ;;  %v580_v4 = vadd.f32 %v578_v58, %v544_v2  ;;  %v587_v5 = vpop.permute.xlu1 %586 }
  0xc6   :  { %v613_v6 = vmul.f32 %v609_v63, %v587_v5  ;;  %v614_v7 = vmul.f32 %v610_v0, %v587_v5 }
  0xc8   :  { %v615_v9 = vadd.f32 %v613_v6, %v579_v3  ;;  %v616_v10 = vadd.f32 %v614_v7, %v580_v4 }
  0xca   :  { %v619_v11 = vadd.f32 %v618_v8, %v615_v9  ;;  %v620_v12 = vadd.f32 %v618_v8, %v616_v10 }
  0xcc   :  { %v623_v13 = vcombine.low %v619_v11, %v620_v12  ;;  %v624_v14 = vcombine.high %v619_v11, %v620_v12 }
  0xce   :  { %v631_v15 = vrot.slane %v623_v13, %v822_v41  ;;  %v638_v16 = vrot.slane %v624_v14, %v822_v41  ;;  %667 = vst.sshfl [vmem:[#allocation6] sm:$0x33 pattern:$0x76325410] %v623_v13 }
  0xcf   :  { %668 = vst.sshfl [vmem:[#allocation6 + $0x8] sm:$0x33 pattern:$0x76325410] %v624_v14 }
  0xd0   :  { %v639_v17 = vcombine.high %v631_v15, %v631_v15  ;;  %v640_v18 = vcombine.high %v638_v16, %v638_v16 }
  0xd2   :  { %646 = vst [vmem:[#allocation6 + $0x4] sm:$0xf] %v639_v17  ;;  %648 = vst [vmem:[#allocation6 + $0xc] sm:$0xf] %v640_v18 }
  0xd3   :  { %653 = vsyncadd [#allocation5], 192  ;;  %s776_s3 = smov [#allocation6]  }
  0xd4   :  { %s654_s8 = sshll.u32 %s776_s3, 4  ;;  %s655_s8 = int_to_ptr.vmem [resolvable:$true] %s654_s8 }
  0xd5   :  { %s730_s2 = scalar_lea.vmem %s655_s8, 64  ;;  %s734_s9 = scalar_lea.vmem %s655_s8, 256 }
  0xd6   :  { %p731_p8 = scmp.ne.s32.totalorder %s655_s8, %s730_s2  ;;  %p735_p9 = scmp.lt.s32.totalorder %s655_s8, %s655_s8 }
  0xd7   :  { %p736_p10 = scmp.lt.s32.totalorder %s734_s9, %s730_s2 }
  0xd9   :  { %p737_p11 = por %p736_p10, %p735_p9 }
  0xdb   :  { %p738_p12 = pnand %p737_p11, %p731_p8 }
  0xdd   :  { %741 = shalt.err (!%p738_p12)
}
  0xde   :  { %s742_s12 = scalar_lea.hbm %s879_s4, 64 }
  0xdf   :  { %p743_p13 = scmp.ne.s32.totalorder %s879_s4, %s742_s12  ;;  %p746_p0 = scmp.lt.u32.totalorder %s742_s12, %s879_s4 }
  0xe1   :  { %p748_p1 = pnand %p746_p0, %p743_p13 }
  0xe3   :  { %751 = shalt.err (!%p748_p1)
}
  0xe4   :  { %s777_s17 = smov 4  }
  0xe5   :  { %660 = dma.vmem_to_hbm [thread:$0]  %s655_s8, 64, %s879_s4, [#allocation5], %s758_s27, %s758_s27, %s777_s17  }
  0xe6   :  { %754 = dma.done.wait [#allocation5], 256  }
  0xe7   :  { %755 = vsyncadd [#allocation5], 4294967040 }
  0xe8   :  { %664 = vsyncpa [#allocation4], 1 }
  0xe9   :  { %665 = vsyncpa [#allocation5], 1 }

</bundles_post_ra>
